<compile_context>
chip_gen: v7x
topology: tpu7x:2x2x1
jax: 0.10.0
libtpu: 0.0.40
codegen_flags: <defaults>
</compile_context>

<pallas_src>
import functools

import jax
import jax.numpy as jnp
from jax.experimental import pallas as pl
from jax.experimental.pallas import tpu as pltpu


def _ffn_kernel(x_ref, w12_ref, w3_ref, o_ref, acc_ref, *, tk):
    # x_ref:   (tm, D)
    # w12_ref: (D, 2*tk)  -> per-chunk packed [W1_k | W2_k]
    # w3_ref:  (tk, D)
    # o_ref:   (tm, D)    acc_ref: (tm, D) f32 scratch
    k = pl.program_id(1)

    @pl.when(k == 0)
    def _init():
        acc_ref[...] = jnp.zeros_like(acc_ref)

    x = x_ref[...]
    # One fused MXU matmul for both gate projections.
    h12 = jnp.dot(x, w12_ref[...], preferred_element_type=jnp.float32)  # (tm, 2*tk)
    h1 = h12[:, :tk]                                                    # w1(x) chunk
    h2 = h12[:, tk:]                                                    # w2(x) chunk
    gated = (h1 * jax.nn.sigmoid(h1) * h2).astype(w3_ref.dtype)         # silu gate
    acc_ref[...] += jnp.dot(gated, w3_ref[...],
                            preferred_element_type=jnp.float32)         # partial w3

    @pl.when(k == pl.num_programs(1) - 1)
    def _store():
        o_ref[...] = acc_ref[...].astype(o_ref.dtype)


def _round_up(x, m):
    return -(-x // m) * m


def _cdiv(a, b):
    return -(-a // b)


def _chip_config():
    """Returns (tm_default, tk_default, vmem_capacity_bytes, two_tensorcores)."""
    kind = ""
    try:
        kind = jax.devices()[0].device_kind.lower()
    except Exception:
        pass
    vmem_cap = None
    try:
        vmem_cap = int(pltpu.get_tpu_info().vmem_capacity_bytes)
    except Exception:
        vmem_cap = None
    if vmem_cap is None:
        vmem_cap = (64 << 20) if "v7" in kind else (128 << 20)
    two_tc = ("v7" in kind) or ("v4" in kind) or ("v5p" in kind)
    if "v7" in kind or vmem_cap <= (64 << 20):
        return 512, 256, vmem_cap, two_tc   # v7x: high HBM BW, only 64 MiB VMEM
    if "v6" in kind:
        return 512, 512, vmem_cap, two_tc   # v6e: needs tm~512 to leave HBM-bound
    return 256, 512, vmem_cap, two_tc       # v5e / v5p / v4 / unknown: balanced


def feed_forward(x, w1t, w2t, w3t, *, tm=None, tk=None, out_dtype=None):
    """x: (B, S, D). w1t/w2t: (D, Dh), w3t: (Dh, D) (pre-transposed for x @ W^T)."""
    B, S, D = x.shape
    Dh = w1t.shape[1]
    assert w1t.shape == (D, Dh) and w2t.shape == (D, Dh) and w3t.shape == (Dh, D)
    out_dtype = out_dtype if out_dtype is not None else x.dtype

    tm_def, tk_def, vmem_cap, two_tc = _chip_config()
    bx = jnp.dtype(x.dtype).itemsize
    bw = jnp.dtype(w1t.dtype).itemsize
    bo = jnp.dtype(out_dtype).itemsize
    if tm is None:
        tm = tm_def
    if tk is None:
        # f32 weights double the weight-tile bytes -> start from a smaller chunk.
        tk = tk_def if bw <= 2 else max(128, tk_def // 2)

    M = B * S

    # Row tile: minimise padding waste for ragged M; on 2-TC chips keep >= 2
    # token tiles so both TensorCores stream weights for small-M (decode) shapes.
    n_tiles = _cdiv(M, tm)
    tm_eff = _round_up(_cdiv(M, n_tiles), 16)
    if two_tc and _cdiv(M, tm_eff) < 2 and M > 16:
        tm_eff = _round_up(_cdiv(M, 2), 16)
    M_pad = _round_up(M, tm_eff)

    # Dh chunk: lane-aligned, no larger than (rounded) Dh.
    tk_eff = _round_up(max(128, min(tk, _round_up(Dh, 128))), 128)

    def tile_bytes(tm_, tk_):
        return (2 * tm_ * D * bx             # x tile (double-buffered)
                + 2 * D * (2 * tk_) * bw     # packed [W1|W2] chunk (double-buffered)
                + 2 * tk_ * D * bw           # W3 chunk (double-buffered)
                + 2 * tm_ * D * bo           # out tile (double-buffered)
                + tm_ * D * 4                # f32 accumulator scratch
                + 6 * tm_ * tk_ * 4)         # h12 / h1 / h2 / gated intermediates

    budget = int(0.75 * vmem_cap)
    while tile_bytes(tm_eff, tk_eff) > budget and tk_eff > 128:
        tk_eff = max(128, tk_eff // 2)
    while tile_bytes(tm_eff, tk_eff) > budget and tm_eff > 16:
        tm_eff = max(16, _round_up(tm_eff // 2, 16))
        M_pad = _round_up(M, tm_eff)

    Dh_pad = _round_up(Dh, tk_eff)
    n_k = Dh_pad // tk_eff

    # Pack weights: zero-pad Dh (exact: silu(0)*0 = 0, zero W3 rows add 0) and
    # interleave W1/W2 per Dh-chunk so one (D, 2*tk) block feeds one matmul.
    # (For a real model, do this packing once at weight-load time.)
    w1p = jnp.pad(w1t, ((0, 0), (0, Dh_pad - Dh))) if Dh_pad != Dh else w1t
    w2p = jnp.pad(w2t, ((0, 0), (0, Dh_pad - Dh))) if Dh_pad != Dh else w2t
    w3p = jnp.pad(w3t, ((0, Dh_pad - Dh), (0, 0))) if Dh_pad != Dh else w3t
    w12 = jnp.concatenate(
        [w1p.reshape(D, n_k, tk_eff), w2p.reshape(D, n_k, tk_eff)], axis=-1
    ).reshape(D, n_k * 2 * tk_eff)

    x2d = x.reshape(M, D)
    if M_pad != M:
        x2d = jnp.pad(x2d, ((0, M_pad - M), (0, 0)))

    grid = (M_pad // tm_eff, n_k)   # (token tiles [parallel], Dh chunks [reduction])

    vmem_limit = int(min(max(tile_bytes(tm_eff, tk_eff) * 5 // 4 + (4 << 20), 32 << 20),
                         int(0.9 * vmem_cap)))

    n_row_tiles = M_pad // tm_eff
    cost = pl.CostEstimate(
        flops=6 * M_pad * D * Dh_pad,
        transcendentals=M_pad * Dh_pad,
        # Weights are re-streamed from HBM once per token tile.
        bytes_accessed=(M_pad * D * bx
                        + n_row_tiles * 3 * D * Dh_pad * bw
                        + M_pad * D * bo),
    )

    out2d = pl.pallas_call(
        functools.partial(_ffn_kernel, tk=tk_eff),
        out_shape=jax.ShapeDtypeStruct((M_pad, D), out_dtype),
        grid_spec=pltpu.PrefetchScalarGridSpec(
            num_scalar_prefetch=0,
            grid=grid,
            in_specs=[
                pl.BlockSpec((tm_eff, D), lambda i, k: (i, 0)),      # x row tile
                pl.BlockSpec((D, 2 * tk_eff), lambda i, k: (0, k)),  # [W1|W2] chunk
                pl.BlockSpec((tk_eff, D), lambda i, k: (k, 0)),      # W3 chunk
            ],
            out_specs=pl.BlockSpec((tm_eff, D), lambda i, k: (i, 0)),
            scratch_shapes=[pltpu.VMEM((tm_eff, D), jnp.float32)],
        ),
        compiler_params=pltpu.CompilerParams(
            dimension_semantics=("parallel", "arbitrary"),
            vmem_limit_bytes=vmem_limit,
        ),
        cost_estimate=cost,
    )(x2d, w12, w3p)

    return out2d[:M].reshape(B, S, D)


def init_params(key, dim, hidden_dim, dtype=jnp.float32):
    """Deterministic nn.Linear-style init (uniform +/- 1/sqrt(fan_in)), bias=False.
    Returns weights already transposed for x @ W^T."""
    k1, k2, k3 = jax.random.split(key, 3)
    b1 = 1.0 / (dim ** 0.5)
    b3 = 1.0 / (hidden_dim ** 0.5)
    # torch weight shapes: w1 (hidden, dim), w2 (hidden, dim), w3 (dim, hidden)
    w1 = jax.random.uniform(k1, (hidden_dim, dim), dtype, -b1, b1)
    w2 = jax.random.uniform(k2, (hidden_dim, dim), dtype, -b1, b1)
    w3 = jax.random.uniform(k3, (dim, hidden_dim), dtype, -b3, b3)
    return w1.T, w2.T, w3.T  # (dim,hidden), (dim,hidden), (hidden,dim)


def _reference(x, w1t, w2t, w3t):
    hi = jax.lax.Precision.HIGHEST
    h1 = jnp.dot(x, w1t, precision=hi)
    swish = h1 * jax.nn.sigmoid(h1)
    return jnp.dot(swish * jnp.dot(x, w2t, precision=hi), w3t, precision=hi)


if __name__ == "__main__":
    batch, seq, dim, hidden_dim = 2, 8, 128, 256

    key = jax.random.PRNGKey(0)
    kx, kp = jax.random.split(key)
    x = jax.random.normal(kx, (batch, seq, dim), jnp.float32)
    w1t, w2t, w3t = init_params(kp, dim, hidden_dim, jnp.float32)

    ref = _reference(x, w1t, w2t, w3t)

    # f32 path; tk=128 forces a 2-step Dh reduction to exercise the accumulator
    # and the fused [W1|W2] chunk packing.
    out = jax.block_until_ready(feed_forward(x, w1t, w2t, w3t, tk=128))
    assert out.shape == (batch, seq, dim)
    assert bool(jnp.allclose(out, ref, atol=2e-3, rtol=2e-3)), "f32 mismatch vs reference"

    # bf16 weights/activations (recommended production path), chip-default tiles,
    # f32 accumulation and f32 output.
    out_bf = jax.block_until_ready(
        feed_forward(x.astype(jnp.bfloat16),
                     w1t.astype(jnp.bfloat16),
                     w2t.astype(jnp.bfloat16),
                     w3t.astype(jnp.bfloat16),
                     out_dtype=jnp.float32))
    assert out_bf.shape == (batch, seq, dim)
    assert bool(jnp.allclose(out_bf, ref, atol=5e-2, rtol=5e-2)), "bf16 mismatch (loose tol)"

    print("KERNEL_OK")
</pallas_src>

<mosaic_0001>
module attributes {stable_mosaic.version = 11 : i64} {
  func.func @_ffn_kernel(%arg0: i32, %arg1: i32, %arg2: memref<16x128xf32, #tpu.memory_space<vmem>>, %arg3: memref<128x256xf32, #tpu.memory_space<vmem>>, %arg4: memref<128x128xf32, #tpu.memory_space<vmem>>, %arg5: memref<16x128xf32, #tpu.memory_space<vmem>>, %arg6: memref<16x128xf32, #tpu.memory_space<vmem>>) attributes {dimension_semantics = [#tpu.dimension_semantics<parallel>, #tpu.dimension_semantics<arbitrary>], iteration_bounds = array<i64: 1, 2>, scalar_prefetch = 0 : i64, scratch_operands = 1 : i64, tpu.core_type = #tpu.core_type<tc>, window_params = [{transform_indices = @transform_0, window_bounds = array<i64: 16, 128>}, {transform_indices = @transform_1, window_bounds = array<i64: 128, 256>}, {transform_indices = @transform_2, window_bounds = array<i64: 128, 128>}, {transform_indices = @transform_3, window_bounds = array<i64: 16, 128>}]} {
    %c0_i32 = arith.constant 0 : i32
    %0 = arith.cmpi eq, %arg1, %c0_i32 : i32
    %1 = arith.extui %0 : i1 to i32
    %c0_i32_0 = arith.constant 0 : i32
    %2 = arith.cmpi ne, %1, %c0_i32_0 : i32
    scf.if %2 {
      %cst_13 = arith.constant 0.000000e+00 : f32
      %23 = vector.broadcast %cst_13 : f32 to vector<16x128xf32>
      %c0_14 = arith.constant 0 : index
      %c0_15 = arith.constant 0 : index
      %24 = vector.load %arg6[%c0_14, %c0_15] : memref<16x128xf32, #tpu.memory_space<vmem>>, vector<16x128xf32>
      tpu.vector_store %arg6[%c0_14, %c0_15], %23 {strides = array<i32>} : memref<16x128xf32, #tpu.memory_space<vmem>>, vector<16x128xf32>,
    } else {
    }
    %c0 = arith.constant 0 : index
    %c0_1 = arith.constant 0 : index
    %3 = vector.load %arg2[%c0, %c0_1] : memref<16x128xf32, #tpu.memory_space<vmem>>, vector<16x128xf32>
    %c0_2 = arith.constant 0 : index
    %c0_3 = arith.constant 0 : index
    %4 = vector.load %arg3[%c0_2, %c0_3] : memref<128x256xf32, #tpu.memory_space<vmem>>, vector<128x256xf32>
    %cst = arith.constant dense<0.000000e+00> : vector<16x256xf32>
    %5 = tpu.matmul %3, %4, %cst {dimension_numbers = #tpu.dot_dimension_numbers<[1], [0], [0], [1], [0, 0, 1, 1], [], []>} : vector<16x128xf32>, vector<128x256xf32>, vector<16x256xf32> -> vector<16x256xf32>
    %6 = vector.extract_strided_slice %5 {offsets = [0, 0], sizes = [16, 128], strides = [1, 1]} : vector<16x256xf32> to vector<16x128xf32>
    %7 = vector.extract_strided_slice %5 {offsets = [0, 128], sizes = [16, 128], strides = [1, 1]} : vector<16x256xf32> to vector<16x128xf32>
    %8 = arith.negf %6 : vector<16x128xf32>
    %9 = math.exp %8 : vector<16x128xf32>
    %cst_4 = arith.constant 1.000000e+00 : f32
    %10 = vector.broadcast %cst_4 : f32 to vector<16x128xf32>
    %11 = arith.addf %10, %9 : vector<16x128xf32>
    %12 = arith.divf %10, %11 : vector<16x128xf32>
    %13 = arith.mulf %6, %12 : vector<16x128xf32>
    %14 = arith.mulf %13, %7 : vector<16x128xf32>
    %c0_5 = arith.constant 0 : index
    %c0_6 = arith.constant 0 : index
    %15 = vector.load %arg6[%c0_5, %c0_6] : memref<16x128xf32, #tpu.memory_space<vmem>>, vector<16x128xf32>
    %c0_7 = arith.constant 0 : index
    %c0_8 = arith.constant 0 : index
    %16 = vector.load %arg4[%c0_7, %c0_8] : memref<128x128xf32, #tpu.memory_space<vmem>>, vector<128x128xf32>
    %cst_9 = arith.constant dense<0.000000e+00> : vector<16x128xf32>
    %17 = tpu.matmul %14, %16, %cst_9 {dimension_numbers = #tpu.dot_dimension_numbers<[1], [0], [0], [1], [0, 0, 1, 1], [], []>} : vector<16x128xf32>, vector<128x128xf32>, vector<16x128xf32> -> vector<16x128xf32>
    %18 = arith.addf %15, %17 : vector<16x128xf32>
    %c0_10 = arith.constant 0 : index
    %c0_11 = arith.constant 0 : index
    %19 = vector.load %arg6[%c0_10, %c0_11] : memref<16x128xf32, #tpu.memory_space<vmem>>, vector<16x128xf32>
    tpu.vector_store %arg6[%c0_10, %c0_11], %18 {strides = array<i32>} : memref<16x128xf32, #tpu.memory_space<vmem>>, vector<16x128xf32>,
    %c1_i32 = arith.constant 1 : i32
    %20 = arith.cmpi eq, %arg1, %c1_i32 : i32
    %21 = arith.extui %20 : i1 to i32
    %c0_i32_12 = arith.constant 0 : i32
    %22 = arith.cmpi ne, %21, %c0_i32_12 : i32
    scf.if %22 {
      %c0_13 = arith.constant 0 : index
      %c0_14 = arith.constant 0 : index
      %23 = vector.load %arg6[%c0_13, %c0_14] : memref<16x128xf32, #tpu.memory_space<vmem>>, vector<16x128xf32>
      %c0_15 = arith.constant 0 : index
      %c0_16 = arith.constant 0 : index
      %24 = vector.load %arg5[%c0_15, %c0_16] : memref<16x128xf32, #tpu.memory_space<vmem>>, vector<16x128xf32>
      tpu.vector_store %arg5[%c0_15, %c0_16], %23 {strides = array<i32>} : memref<16x128xf32, #tpu.memory_space<vmem>>, vector<16x128xf32>,
    } else {
    }
    return
  }
  func.func @transform_0(%arg0: i32, %arg1: i32) -> (i32, i32) {
    %c0_i32 = arith.constant 0 : i32
    %c0_i32_0 = arith.constant 0 : i32
    return %arg0, %c0_i32 : i32, i32
  }
  func.func @transform_1(%arg0: i32, %arg1: i32) -> (i32, i32) {
    %c0_i32 = arith.constant 0 : i32
    %c0_i32_0 = arith.constant 0 : i32
    return %c0_i32, %arg1 : i32, i32
  }
  func.func @transform_2(%arg0: i32, %arg1: i32) -> (i32, i32) {
    %c0_i32 = arith.constant 0 : i32
    %c0_i32_0 = arith.constant 0 : i32
    return %arg1, %c0_i32 : i32, i32
  }
  func.func @transform_3(%arg0: i32, %arg1: i32) -> (i32, i32) {
    %c0_i32 = arith.constant 0 : i32
    %c0_i32_0 = arith.constant 0 : i32
    return %arg0, %c0_i32 : i32, i32
  }
}

</mosaic_0001>

<bundles_post_ra>
// kernel: tpu_custom_call.1
= control target key start
LH: loop header
LB: loop body
LE: loop exit
PB: predicated region body
PF: predicated region fallthrough
CT: control target
= control target key end

     0   :  { %8 = vsyncpa [#allocation4], 0  ;;  %s1329_s0 = inlined_call_operand.hbm [shape: f32[16,128], index: 0, kind: input, shape index: {}]   ;;  %s1330_s1 = inlined_call_operand.hbm [shape: f32[128,512], index: 1, kind: input, shape index: {}]   ;;  %s1331_s2 = inlined_call_operand.hbm [shape: f32[256,128], index: 2, kind: input, shape index: {}]   ;;  %s1332_s3 = inlined_call_operand.hbm [shape: f32[16,128], index: 3, kind: output, shape index: {}]  }
   0x1   :  { %9 = vsyncpa [#allocation7], 0 }
   0x2   :  { %11 = vsyncpa [#allocation7 + $0x1], 0 }
   0x3   :  { %12 = vsyncpa [#allocation5], 0  ;;  %s1046_s12 = smov 0   ;;  %s1048_s13 = smov 0  }
   0x4   :  { %s1050_s14 = smov 0   ;;  %s1052_s15 = smov 0  }
   0x5   :  { %s1054_s16 = smov 0   ;;  %s1056_s17 = smov 0  }
   0x6 LB: > { %s27_s18 = sadd.s32 1, %s1007_s16  ;;  %s63_s19 = sadd.s32 1, %s999_s14  ;;  %s1011_s17 = sphi %s1056_s17, %s18_s17   ;;  %s1007_s16 = sphi %s1054_s16, %s1354_s16   ;;  %s1003_s15 = sphi %s1052_s15, %s1353_s15   ;;  %s999_s14 = sphi %s1050_s14, %s1352_s14   ;;  %s995_s13 = sphi %s1048_s13, %s1351_s13   ;;  %s991_s12 = sphi %s1046_s12, %s1350_s12  }
   0x7   : > { %p28_p0 = scmp.ge.s32.totalorder %s27_s18, 2  ;;  %p70_p1 = scmp.ne.s32.totalorder %s999_s14, %s995_s13 }
   0x8   : > { %p71_p2 = scmp.eq.s32.totalorder %s1011_s17, 0  ;;  %p768_p4 = scmp.lt.s32.totalorder %s1011_s17, 2 }
   0x9   : > { %s1356_s18 = smov (%p28_p0, %s27_s18), 0  ;;  %s168_s21 = sand.u32 1, %s1011_s17  }
   0xa   : > { %p72_p3 = por %p71_p2, %p70_p1  ;;  %s60_s20 = ssub.s32 %s1007_s16, %s1356_s18 }
   0xb   : > { %p61_p5 = scmp.eq.s32.totalorder %s60_s20, 0  ;;  %s170_s22 = sand.u32 1, %s999_s14  }
   0xc   : > { %s625_s23 = sshll.u32 %s1007_s16, 8  ;;  %s607_s25 = sshll.u32 %s170_s22, 8 }
   0xd   : > { %s1090_s24 = scalar_select %p61_p5, %s999_s14, %s63_s19  }
   0xe   : > { %s1097_s28 = scalar_lea.hbm %s1330_s1, %s625_s23  ;;  %p1099_p6 = pnand %p768_p4, %p72_p3 }
   0xf   : > { %s172_s30 = scalar_lea.vmem [#allocation6], %s607_s25  ;;  %s1105_s5 = scalar_lea.sflag [#allocation7], %s168_s21 }
  0x10   : > { %s1339_s29 = scalar_select %p1099_p6, 1, 0 }
  0x11   : > { %s179_s4 = sshll.u32 %s172_s30, 4  ;;  %s839_s6 = scalar_lea.hbm %s1097_s28, 4096  ;;  %s1103_s4 = int_to_ptr.vmem [resolvable:$true] %s179_s4 }
  0x12   : > { %p840_p7 = scmp.ne.s32.totalorder %s1097_s28, %s839_s6  ;;  %p1334_p8 = pneg %p1099_p6 }
  0x13   : > { %s844_s9 = scalar_lea.hbm %s1330_s1, 8192  ;;  %p845_p11 = scmp.lt.u32.totalorder %s1097_s28, %s1330_s1 }
  0x14   : > { %p842_p9 = pnand %p1334_p8, %p840_p7  ;;  %p846_p12 = scmp.lt.u32.totalorder %s844_s9, %s839_s6 }
  0x15   : > { %p848_p0 = scmp.lt.u32.totalorder %s839_s6, %s1097_s28 }
  0x16   : > { %p843_p10 = pneg %p842_p9  ;;  %p847_p13 = por %p846_p12, %p845_p11 }
  0x18   : > { %p849_p1 = por %p848_p0, %p847_p13 }
  0x1a   : > { %p850_p2 = pnand %p849_p1, %p843_p10 }
  0x1c   : > { %853 = shalt.err (!%p850_p2)
}
  0x1d   : > { %s854_s19 = scalar_lea.vmem %s1103_s4, 4096  ;;  %s1013_s20 = smov [#allocation6]  }
  0x1e   : > { %p855_p3 = scmp.ne.s32.totalorder %s1103_s4, %s854_s19  ;;  %s859_s21 = sshll.u32 %s1013_s20, 4  ;;  %s860_s21 = int_to_ptr.vmem [resolvable:$false] %s859_s21 }
  0x1f   : > { %s861_s23 = scalar_lea.vmem %s860_s21, 8192  ;;  %p862_p7 = scmp.lt.s32.totalorder %s1103_s4, %s860_s21 }
  0x20   : > { %p857_p4 = pnand %p855_p3, %p1334_p8  ;;  %p863_p9 = scmp.lt.s32.totalorder %s861_s23, %s854_s19 }
  0x22   : > { %p858_p5 = pneg %p857_p4  ;;  %p864_p11 = por %p863_p9, %p862_p7 }
  0x24   : > { %p865_p12 = pnand %p864_p11, %p858_p5 }
  0x26   : > { %868 = shalt.err (!%p865_p12)
}
  0x27   : > { %s1014_s25 = smov 512   ;;  %s1015_s26 = smov 256  }
  0x28   : > { %s1016_s27 = smov 16   ;;  %s1134_s30 = sadd.s32 4294967295, %s1011_s17  }
  0x29   : > { %763 = dma.hbm_to_vmem [thread:$0]  (!%p1099_p6), %s1097_s28, 4096, %s1103_s4, %s1105_s5, %s1014_s25, %s1015_s26, %s1016_s27  }
  0x2a   : > { %p76_p10 = scmp.ne.s32.totalorder %s995_s13, %s991_s12  ;;  %p1333_p13 = scmp.eq.s32.totalorder %s1134_s30, 0 }
  0x2b   : > { %p604_p0 = scmp.ge.s32.totalorder %s1011_s17, 1  ;;  %p139_p1 = scmp.lt.s32.totalorder %s1011_s17, 3 }
  0x2c   : > { %p1143_p2 = por %p1333_p13, %p76_p10  ;;  %s1017_s28 = smov [#allocation3]  }
  0x2d   : > { %p1147_p3 = pnand %p604_p0, %p139_p1  ;;  %s154_s4 = sshll.u32 %s1017_s28, 4  ;;  %s1151_s4 = int_to_ptr.vmem [resolvable:$true] %s154_s4 }
  0x2e   : > { %s1340_s6 = scalar_select %p1143_p2, 1, 0 }
  0x2f   : > { %s1341_s7 = scalar_select %p1147_p3, 1, 0 }
  0x30   : > { %p756_p4 = pneg %p1147_p3  ;;  %s610_s12 = sshll.u32 %s170_s22, 7 }
  0x31   : > { %s626_s8 = sshll.u32 %s1007_s16, 11  ;;  %s193_s20 = scalar_lea.vmem [#allocation8], %s610_s12 }
  0x32   : > { %p1160_p5 = pnand %p756_p4, %p1333_p13  ;;  %s1167_s19 = scalar_lea.hbm %s1331_s2, %s626_s8 }
  0x33   : > { %s200_s21 = sshll.u32 %s193_s20, 4  ;;  %s869_s22 = scalar_lea.hbm %s1329_s0, 256  ;;  %s1169_s21 = int_to_ptr.vmem [resolvable:$true] %s200_s21 }
  0x34   : > { %p870_p7 = scmp.ne.s32.totalorder %s1329_s0, %s869_s22  ;;  %p871_p9 = pneg %p1160_p5 }
  0x35   : > { %p876_p10 = scmp.lt.u32.totalorder %s869_s22, %s1329_s0 }
  0x36   : > { %p872_p11 = pnand %p871_p9, %p870_p7 }
  0x38   : > { %p873_p12 = pneg %p872_p11 }
  0x3a   : > { %p878_p0 = pnand %p876_p10, %p873_p12 }
  0x3c   : > { %881 = shalt.err (!%p878_p0)
}
  0x3d   : > { %s882_s12 = scalar_lea.vmem %s1151_s4, 256  ;;  %p890_p8 = scmp.lt.s32.totalorder %s1151_s4, %s1151_s4 }
  0x3e   : > { %p883_p1 = scmp.ne.s32.totalorder %s1151_s4, %s882_s12  ;;  %p891_p2 = scmp.lt.s32.totalorder %s882_s12, %s882_s12 }
  0x40   : > { %p885_p4 = pnand %p883_p1, %p871_p9  ;;  %p892_p3 = por %p891_p2, %p890_p8 }
  0x42   : > { %p886_p13 = pneg %p885_p4 }
  0x44   : > { %p893_p6 = pnand %p892_p3, %p886_p13 }
  0x46   : > { %896 = shalt.err (!%p893_p6)
}
  0x47   : > { %s1018_s8 = smov 128   ;;  %s1019_s11 = smov 8  }
  0x48   : > { %759 = dma.hbm_to_vmem [thread:$0]  (!%p1160_p5), %s1329_s0, 256, %s1151_s4, [#allocation4], %s1018_s8, %s1018_s8, %s1019_s11  }
  0x49   : > { %s897_s25 = scalar_lea.hbm %s1167_s19, 2048  ;;  %p1343_p6 = scmp.ne.s32.totalorder %s1339_s29, 0 }
  0x4a   : > { %p898_p8 = scmp.ne.s32.totalorder %s1167_s19, %s897_s25  ;;  %s902_s27 = scalar_lea.hbm %s1331_s2, 4096 }
  0x4b   : > { %p1344_p13 = pneg %p1343_p6  ;;  %p903_p7 = scmp.lt.u32.totalorder %s1167_s19, %s1331_s2 }
  0x4c   : > { %p904_p9 = scmp.lt.u32.totalorder %s902_s27, %s897_s25  ;;  %p906_p12 = scmp.lt.u32.totalorder %s897_s25, %s1167_s19 }
  0x4d   : > { %p900_p2 = pnand %p898_p8, %p1344_p13 }
  0x4e   : > { %p905_p11 = por %p904_p9, %p903_p7 }
  0x4f   : > { %p901_p3 = pneg %p900_p2 }
  0x50   : > { %p907_p10 = por %p906_p12, %p905_p11 }
  0x52   : > { %p908_p0 = pnand %p907_p10, %p901_p3 }
  0x54   : > { %911 = shalt.err (!%p908_p0)
}
  0x55   : > { %s912_s4 = scalar_lea.vmem %s1169_s21, 2048  ;;  %p1345_p1 = pmov %p1344_p13 }
  0x56   : > { %p913_p5 = scmp.ne.s32.totalorder %s1169_s21, %s912_s4  ;;  %s1020_s9 = smov [#allocation8]  }
  0x57   : > { %s917_s12 = sshll.u32 %s1020_s9, 4  ;;  %s918_s12 = int_to_ptr.vmem [resolvable:$false] %s917_s12 }
  0x58   : > { %p915_p4 = pnand %p913_p5, %p1345_p1  ;;  %s919_s20 = scalar_lea.vmem %s918_s12, 4096 }
  0x59   : > { %p920_p13 = scmp.lt.s32.totalorder %s1169_s21, %s918_s12  ;;  %p921_p2 = scmp.lt.s32.totalorder %s919_s20, %s912_s4 }
  0x5a   : > { %p916_p8 = pneg %p915_p4 }
  0x5b   : > { %p922_p7 = por %p921_p2, %p920_p13 }
  0x5d   : > { %p923_p9 = pnand %p922_p7, %p916_p8 }
  0x5f   : > { %926 = shalt.err (!%p923_p9)
}
  0x60   : > { %766 = dma.hbm_to_vmem [thread:$0]  (!%p1343_p6), %s1167_s19, 2048, %s1169_s21, %s1105_s5, %s1018_s8, %s1018_s8, %s1019_s11  }
  0x61   : > { %p1346_p3 = scmp.ne.s32.totalorder %s1341_s7, 0 }
  0x62   : > { %p1347_p11 = scmp.eq.s32.totalorder (!%p1346_p3), %s1134_s30, 0 }
  0x63   : > { %212 = sbr.rel (%p1346_p3) target bundleno = 652 (0x28c), region = 32 }
  0x6a   : > { %978 = dma.done.wait (%p1347_p11), [#allocation4], 256   ;;  %p1348_p12 = pmov %p1347_p11 }
  0x6b   : > { %s218_s29 = sand.u32 1, %s1134_s30   ;;  %s220_s23 = sand.u32 1, %s995_s13  }
  0x6c   : > { %980 = vsyncadd (%p1348_p12), [#allocation4], 4294967040  ;;  %s615_s25 = sshll.u32 %s220_s23, 8  ;;  %s219_s22 = scalar_lea.sflag [#allocation7], %s218_s29 }
  0x6d   : > { %s1230_s26 = scalar_lea.vmem [#allocation6], %s615_s25  ;;  %p1349_p10 = scmp.ne.s32.totalorder %s1340_s6, 0 }
  0x6f   : > { %982 = dma.done.wait (%p1349_p10), %s219_s22, 6144  }
  0x70   : > { %984 = vsyncadd (%p1349_p10), %s219_s22, 4294961152  ;;  %s616_s5 = sshll.u32 %s220_s23, 7  ;;  %p617_p6 = scmp.ne.s32.totalorder %s1003_s15, 0 }
  0x71   : > { %s1236_s7 = scalar_lea.vmem [#allocation8], %s616_s5  ;;  %v1021_v0 = vmov (!%p617_p6), 0.0  }
  0x72   : > { %261 = sbr.rel (%p617_p6) target bundleno = 121 (0x79), region = 48  ;;  %262 = vst [vmem:[#allocation2] sm:$0xff] (!%p617_p6), %v1021_v0  ;;  %263 = vst [vmem:[#allocation2 + $0x8] sm:$0xff] (!%p617_p6), %v1021_v0 }
  0x79 PF: > { %v267_v1 = vld [vmem:[%s1230_s26 + $0x8] sm:$0xff]  ;;  %v269_v2 = vld [vmem:[%s1230_s26 + $0x18] sm:$0xff]  ;;  %v266_v3 = vld [vmem:[%s1230_s26] sm:$0xff]  ;;  %v1022_v8 = vmov 0.0   ;;  %p620_p0 = scmp.ne.s32.totalorder %s1003_s15, 1 }
  0x7a   : > { %v680_v4 = vpack.c.bf16 %v269_v2, %v267_v1  ;;  %v268_v5 = vld [vmem:[%s1230_s26 + $0x10] sm:$0xff]  ;;  %v271_v6 = vld [vmem:[%s1230_s26 + $0x28] sm:$0xff]  ;;  %v273_v7 = vld [vmem:[%s1230_s26 + $0x38] sm:$0xff]  ;;  %362 = vmatprep.mubr.f32.mxu0 %v1022_v8 }
  0x7b   : > { %v682_v9 = vpack.c.bf16 %v268_v5, %v266_v3  ;;  %v684_v10 = vpack.c.bf16 %v273_v7, %v271_v6  ;;  %v270_v11 = vld [vmem:[%s1230_s26 + $0x20] sm:$0xff]  ;;  %v272_v12 = vld [vmem:[%s1230_s26 + $0x30] sm:$0xff]  ;;  %v275_v13 = vld [vmem:[%s1230_s26 + $0x48] sm:$0xff] }
  0x7c   : > { %681 = vmatprep.subr.bf16.mxu0 %v680_v4  ;;  %v277_v14 = vld [vmem:[%s1230_s26 + $0x58] sm:$0xff]  ;;  %v686_v15 = vpack.c.bf16 %v272_v12, %v270_v11  ;;  %v274_v17 = vld [vmem:[%s1230_s26 + $0x40] sm:$0xff]  ;;  %v276_v18 = vld [vmem:[%s1230_s26 + $0x50] sm:$0xff] }
  0x7d   : > { %683 = vmatpush1.bf16.msra.mxu0 %v682_v9  ;;  %v688_v16 = vpack.c.bf16 %v277_v14, %v275_v13  ;;  %v279_v19 = vld [vmem:[%s1230_s26 + $0x68] sm:$0xff]  ;;  %v281_v20 = vld [vmem:[%s1230_s26 + $0x78] sm:$0xff]  ;;  %v690_v21 = vpack.c.bf16 %v276_v18, %v274_v17  ;;  %v278_v23 = vld [vmem:[%s1230_s26 + $0x60] sm:$0xff] }
  0x7e   : > { %685 = vmatprep.subr.bf16.mxu0 %v684_v10  ;;  %v692_v22 = vpack.c.bf16 %v281_v20, %v279_v19  ;;  %v280_v24 = vld [vmem:[%s1230_s26 + $0x70] sm:$0xff]  ;;  %v283_v25 = vld [vmem:[%s1230_s26 + $0x88] sm:$0xff]  ;;  %v285_v26 = vld [vmem:[%s1230_s26 + $0x98] sm:$0xff] }
  0x7f   : > { %v694_v27 = vpack.c.bf16 %v280_v24, %v278_v23  ;;  %v696_v28 = vpack.c.bf16 %v285_v26, %v283_v25  ;;  %v282_v29 = vld [vmem:[%s1230_s26 + $0x80] sm:$0xff]  ;;  %v284_v30 = vld [vmem:[%s1230_s26 + $0x90] sm:$0xff]  ;;  %v287_v31 = vld [vmem:[%s1230_s26 + $0xa8] sm:$0xff] }
  0x80   : > { %v289_v32 = vld [vmem:[%s1230_s26 + $0xb8] sm:$0xff]  ;;  %v698_v33 = vpack.c.bf16 %v284_v30, %v282_v29  ;;  %v286_v35 = vld [vmem:[%s1230_s26 + $0xa0] sm:$0xff]  ;;  %v288_v36 = vld [vmem:[%s1230_s26 + $0xb0] sm:$0xff] }
  0x81   : > { %687 = vmatpush1.bf16.msra.mxu0 %v686_v15  ;;  %v700_v34 = vpack.c.bf16 %v289_v32, %v287_v31  ;;  %v291_v37 = vld [vmem:[%s1230_s26 + $0xc8] sm:$0xff]  ;;  %v293_v38 = vld [vmem:[%s1230_s26 + $0xd8] sm:$0xff]  ;;  %v702_v39 = vpack.c.bf16 %v288_v36, %v286_v35  ;;  %v290_v41 = vld [vmem:[%s1230_s26 + $0xc0] sm:$0xff] }
  0x82   : > { %689 = vmatprep.subr.bf16.mxu0 %v688_v16  ;;  %v704_v40 = vpack.c.bf16 %v293_v38, %v291_v37  ;;  %v292_v42 = vld [vmem:[%s1230_s26 + $0xd0] sm:$0xff]  ;;  %v295_v43 = vld [vmem:[%s1230_s26 + $0xe8] sm:$0xff]  ;;  %v297_v44 = vld [vmem:[%s1230_s26 + $0xf8] sm:$0xff] }
  0x83   : > { %v706_v45 = vpack.c.bf16 %v292_v42, %v290_v41  ;;  %v708_v46 = vpack.c.bf16 %v297_v44, %v295_v43  ;;  %v294_v47 = vld [vmem:[%s1230_s26 + $0xe0] sm:$0xff]  ;;  %v296_v48 = vld [vmem:[%s1230_s26 + $0xf0] sm:$0xff]  ;;  %v265_v51 = vld [vmem:[#allocation3 + $0x8] sm:$0xff] }
  0x84   : > { %v710_v49 = vpack.c.bf16 %v296_v48, %v294_v47  ;;  %v264_v50 = vld [vmem:[#allocation3] sm:$0xff]  ;;  %v393_v52 = vld [vmem:[%s1236_s7] sm:$0xff]  ;;  %v394_v53 = vld [vmem:[%s1236_s7 + $0x8] sm:$0xff] }
  0x85   : > { %691 = vmatpush1.bf16.msra.mxu0 %v690_v21  ;;  %v712_v54 = vpack.c.bf16 %v394_v53, %v393_v52  ;;  %v395_v55 = vld [vmem:[%s1236_s7 + $0x10] sm:$0xff]  ;;  %v396_v56 = vld [vmem:[%s1236_s7 + $0x18] sm:$0xff]  ;;  %v397_v58 = vld [vmem:[%s1236_s7 + $0x20] sm:$0xff] }
  0x86   : > { %693 = vmatprep.subr.bf16.mxu0 %v692_v22  ;;  %v716_v57 = vpack.c.bf16 %v396_v56, %v395_v55  ;;  %v398_v59 = vld [vmem:[%s1236_s7 + $0x28] sm:$0xff]  ;;  %v399_v61 = vld [vmem:[%s1236_s7 + $0x30] sm:$0xff]  ;;  %v400_v62 = vld [vmem:[%s1236_s7 + $0x38] sm:$0xff] }
  0x87   : > { %713 = vmatprep.subr.bf16.mxu1 %v712_v54  ;;  %v720_v60 = vpack.c.bf16 %v398_v59, %v397_v58  ;;  %v724_v63 = vpack.c.bf16 %v400_v62, %v399_v61  ;;  %v401_v0 = vld [vmem:[%s1236_s7 + $0x40] sm:$0xff]  ;;  %v402_v1 = vld [vmem:[%s1236_s7 + $0x48] sm:$0xff]  ;;  %v403_v3 = vld [vmem:[%s1236_s7 + $0x50] sm:$0xff] }
  0x88   : > { %715 = vmatpush3.bf16.msra.mxu1 %v712_v54  ;;  %v728_v2 = vpack.c.bf16 %v402_v1, %v401_v0  ;;  %v404_v4 = vld [vmem:[%s1236_s7 + $0x58] sm:$0xff]  ;;  %v405_v6 = vld [vmem:[%s1236_s7 + $0x60] sm:$0xff]  ;;  %v406_v7 = vld [vmem:[%s1236_s7 + $0x68] sm:$0xff] }
  0x89   : > { %695 = vmatpush1.bf16.msra.mxu0 %v694_v27  ;;  %717 = vmatprep.subr.bf16.mxu1 %v716_v57  ;;  %v732_v5 = vpack.c.bf16 %v404_v4, %v403_v3  ;;  %v407_v9 = vld [vmem:[%s1236_s7 + $0x70] sm:$0xff]  ;;  %v408_v10 = vld [vmem:[%s1236_s7 + $0x78] sm:$0xff]  ;;  %v391_v29 = vld [vmem:[#allocation2] sm:$0xff] }
  0x8a   : > { %697 = vmatprep.subr.bf16.mxu0 %v696_v28  ;;  %v740_v11 = vpack.c.bf16 %v408_v10, %v407_v9  ;;  %v392_v28 = vld [vmem:[#allocation2 + $0x8] sm:$0xff] }
  0x8c   : > { %719 = vmatpush3.bf16.msra.mxu1 %v716_v57 }
  0x8d   : > { %699 = vmatpush1.bf16.msra.mxu0 %v698_v33  ;;  %721 = vmatprep.subr.bf16.mxu1 %v720_v60 }
  0x8e   : > { %701 = vmatprep.subr.bf16.mxu0 %v700_v34 }
  0x90   : > { %723 = vmatpush3.bf16.msra.mxu1 %v720_v60 }
  0x91   : > { %703 = vmatpush1.bf16.msra.mxu0 %v702_v39  ;;  %725 = vmatprep.subr.bf16.mxu1 %v724_v63 }
  0x92   : > { %705 = vmatprep.subr.bf16.mxu0 %v704_v40 }
  0x94   : > { %727 = vmatpush3.bf16.msra.mxu1 %v724_v63 }
  0x95   : > { %707 = vmatpush1.bf16.msra.mxu0 %v706_v45  ;;  %729 = vmatprep.subr.bf16.mxu1 %v728_v2 }
  0x96   : > { %709 = vmatprep.subr.bf16.mxu0 %v708_v46 }
  0x98   : > { %731 = vmatpush3.bf16.msra.mxu1 %v728_v2 }
  0x99   : > { %711 = vmatpush1.bf16.msra.mxu0 %v710_v49  ;;  %733 = vmatprep.subr.bf16.mxu1 %v732_v5 }
  0x9c   : > { %363 = vmatmul.mubr.f32.vlgmr.msra.gmra.mrb[0].mxu0 %v264_v50  ;;  %735 = vmatpush3.bf16.msra.mxu1 %v732_v5 }
  0x9d   : > { %368 = vmatprep.mubr.f32.mxu0 %v1022_v8  ;;  %v736_v8 = vpack.c.bf16 %v406_v7, %v405_v6 }
  0x9f   : > { %737 = vmatprep.subr.bf16.mxu1 %v736_v8 }
  0xa0   : > { %369 = vmatmul.mubr.f32.gmra.mrb[2].mxu0 %v265_v51  ;;  %739 = vmatpush3.bf16.msra.mxu1 %v736_v8 }
  0xa1   : > { %741 = vmatprep.subr.bf16.mxu1 %v740_v11 }
  0xa4   : > { %743 = vmatpush3.bf16.msra.mxu1 %v740_v11 }
 0x16f   : > { %v364_v12 = vpop.f32.mrb[0].mxu0 }
 0x170   : > { %v618_v13 = vmul.f32 -1.442695, %v364_v12  ;;  %v366_v14 = vpop.f32.mrb[1].mxu0 }
 0x172   : > { %831 = vpow2.f32 %v618_v13 }
 0x173   : > { %v370_v15 = vpop.f32.mrb[2].mxu0 }
 0x174   : > { %v619_v16 = vmul.f32 -1.442695, %v370_v15  ;;  %v372_v17 = vpop.f32.mrb[3].mxu0 }
 0x176   : > { %833 = vpow2.f32 %v619_v16 }
 0x17c   : > { %v832_v18 = vpop.eup %831 }
 0x17d   : > { %v381_v19 = vadd.f32 1.0, %v832_v18 }
 0x17f   : > { %835 = vrcp.f32 %v381_v19 }
 0x180   : > { %v834_v20 = vpop.eup %833 }
 0x181   : > { %v382_v21 = vadd.f32 1.0, %v834_v20 }
 0x183   : > { %837 = vrcp.f32 %v382_v21 }
 0x189   : > { %v836_v22 = vpop.eup %835 }
 0x18a   : > { %v387_v23 = vmul.f32 %v836_v22, %v364_v12 }
 0x18c   : > { %v389_v24 = vmul.f32 %v387_v23, %v366_v14 }
 0x18d   : > { %v838_v25 = vpop.eup %837 }
 0x18e   : > { %v388_v26 = vmul.f32 %v838_v25, %v370_v15  ;;  %677 = vmatprep.mubr.f32.mxu1 %v389_v24 }
 0x190   : > { %v390_v27 = vmul.f32 %v388_v26, %v372_v17 }
 0x192   : > { %678 = vmatmul.mubr.f32.vlgmr.msra.gmra.mrb[0].mxu1 %v390_v27 }
 0x263   : > { %491 = sbr.rel (%p620_p0) target bundleno = 626 (0x272), region = 52 }
 0x265   : > { %v679_v30 = vpop.f32.mrb[0].mxu1 }
 0x266   : > { %v485_v31 = vadd.f32 %v679_v30, %v392_v28  ;;  %v475_v32 = vpop.f32.mrb[1].mxu1 }
 0x267   : > { %v484_v33 = vadd.f32 %v475_v32, %v391_v29 }
 0x268   : > { %487 = vst [vmem:[#allocation2 + $0x8] sm:$0xff] %v485_v31 }
 0x269   : > { %486 = vst [vmem:[#allocation2] sm:$0xff] %v484_v33 }
 0x26f   : > { %v493_v35 = vld [vmem:[#allocation2 + $0x8] sm:$0xff] }
 0x270   : > { %v492_v34 = vld [vmem:[#allocation2] sm:$0xff]  ;;  %495 = vst [vmem:[#allocation9 + $0x8] sm:$0xff] %v493_v35 }
 0x271   : > { %494 = vst [vmem:[#allocation9] sm:$0xff] %v492_v34 }
 0x272 PF: > { %p770_p5 = scmp.eq.s32.totalorder %s1134_s30, 1  ;;  %s1023_s6 = smov [#allocation9]  }
 0x273   : > { %s505_s19 = sshll.u32 %s1023_s6, 4  ;;  %s506_s19 = int_to_ptr.vmem [resolvable:$true] %s505_s19 }
 0x274   : > { %s927_s21 = scalar_lea.vmem %s506_s19, 256  ;;  %p934_p13 = scmp.lt.s32.totalorder %s506_s19, %s506_s19 }
 0x275   : > { %p928_p1 = scmp.ne.s32.totalorder %s506_s19, %s927_s21  ;;  %p935_p2 = scmp.lt.s32.totalorder %s927_s21, %s927_s21 }
 0x277   : > { %p929_p4 = pnand %p928_p1, %p770_p5  ;;  %p936_p7 = por %p935_p2, %p934_p13 }
 0x279   : > { %p930_p8 = pneg %p929_p4 }
 0x27b   : > { %p937_p9 = pnand %p936_p7, %p930_p8 }
 0x27d   : > { %940 = shalt.err (!%p937_p9)
}
 0x27e   : > { %s941_s11 = scalar_lea.hbm %s1332_s3, 256 }
 0x27f   : > { %p942_p3 = scmp.ne.s32.totalorder %s1332_s3, %s941_s11  ;;  %p947_p10 = scmp.lt.u32.totalorder %s941_s11, %s1332_s3 }
 0x281   : > { %p943_p11 = pnand %p942_p3, %p770_p5 }
 0x283   : > { %p944_p12 = pneg %p943_p11 }
 0x285   : > { %p949_p6 = pnand %p947_p10, %p944_p12 }
 0x287   : > { %952 = shalt.err (!%p949_p6)
}
 0x288   : > { %s1024_s9 = smov 128   ;;  %s1025_s12 = smov 8  }
 0x289   : > { %753 = dma.vmem_to_hbm [thread:$0]  (%p770_p5), %s506_s19, 256, %s1332_s3, [#allocation5], %s1024_s9, %s1024_s9, %s1025_s12  }
 0x28a   : > { %986 = dma.done.wait (%p770_p5), [#allocation5], 256  }
 0x28b   : > { %988 = vsyncadd (%p770_p5), [#allocation5], 4294967040 }
 0x28c PF: > { %s18_s17 = sadd.s32 1, %s1011_s17   ;;  %s1350_s12 = smov %s995_s13 }
 0x28d   : > { %p15_p0 = scmp.ge.s32.totalorder %s18_s17, 4   ;;  %s1351_s13 = smov %s999_s14 }
 0x28e   : > { %s1352_s14 = smov %s1090_s24  ;;  %s1353_s15 = smov %s1007_s16 }
 0x28f   : > { %s1354_s16 = smov %s1356_s18  ;;  %17 = sbr.rel (!%p15_p0) target bundleno = 6 (0x6), region = 95 }
 0x296   :  { %521 = vsyncpa [#allocation4], 1 }
 0x297   :  { %523 = vsyncpa [#allocation4 + $0x1], 1 }
 0x298   :  { %524 = vsyncpa [#allocation7], 1 }
 0x299   :  { %526 = vsyncpa [#allocation7 + $0x1], 1 }
 0x29a   :  { %527 = vsyncpa [#allocation5], 1 }
 0x29b   :  { %529 = vsyncpa [#allocation5 + $0x1], 1 }

</bundles_post_ra>
